<compile_context>
chip_gen: v7x
topology: tpu7x:2x2x1
jax: 0.10.0
libtpu: 0.0.40
codegen_flags: <defaults>
</compile_context>

<pallas_src>
import jax
import jax.numpy as jnp
from jax.experimental import pallas as pl
from jax.experimental.pallas import tpu as pltpu


def poly_encoder_score_kernel(item_ref, defs_ref, score_ref):
    """score[b, :] tile = defs_tile @ item_b, produced lane-dense.

    item_ref:  (1, 1, H)   one item embedding
    defs_ref:  (1, TD, H)  one tile of definition embeddings
    score_ref: (1, 1, TD)  lane-dense score tile
    """
    item = item_ref[0]                                    # (1, H), input dtype
    defs = defs_ref[0]                                    # (TD, H), input dtype

    # Trace-time dtype reconciliation (only triggers for mixed-precision inputs).
    if item.dtype != defs.dtype:
        cd = jnp.promote_types(item.dtype, defs.dtype)
        item = item.astype(cd)
        defs = defs.astype(cd)

    # Contract last axes: (1, H) x (TD, H)^T -> (1, TD). Result lands lane-dense
    # (full vst stores), no transpose, f32 accumulation.
    score = jax.lax.dot_general(
        item, defs,
        dimension_numbers=(((1,), (1,)), ((), ())),
        preferred_element_type=jnp.float32)
    score_ref[0] = score.astype(score_ref.dtype)


def poly_encoder_forward_batched(item_embeddings, definition_embeddings, code_weights,
                                 mwe_code_weights=None, mwe=False, *, block_d=2048):
    """B independent (item, definitions) pairs in one pallas_call.

    item_embeddings:       (B, H)
    definition_embeddings: (B, D, H)
    Returns (attended_context (B, D, H), score (B, D)), i.e. PolyEncoderModule.forward
    applied per pair.  With target_item_only=True the code-embedding VALUES cancel out of
    the math (size-1 softmax, then a uniform softmax over identical logits); only the
    table's hidden size is consulted and the mwe flag selects which table that is, so the
    outputs match the PyTorch module exactly.
    """
    # TODO(synk): target_item_only=False raises NotImplementedError in the PyTorch module,
    #             so only the target_item_only=True path is implemented here.
    codes = mwe_code_weights if (mwe and mwe_code_weights is not None) else code_weights
    hidden = codes.shape[-1]

    items = jnp.asarray(item_embeddings)                   # (B, H)
    defs = jnp.asarray(definition_embeddings)              # (B, D, H)
    b, d = defs.shape[0], defs.shape[1]
    assert items.shape == (b, hidden) and defs.shape[-1] == hidden
    out_dtype = jnp.result_type(items.dtype, defs.dtype)

    # ---- tile selection along the definitions axis --------------------------------------
    # Validate caller-supplied block_d: must be a multiple of 128 for lane-dense score tiles.
    block_d = max(128, int(pl.cdiv(int(block_d), 128)) * 128)
    if d > block_d:
        td = block_d                      # multiple of 128 -> aligned defs/score blocks
    elif b == 1 and d > 256:
        # Single pair, mid-size D: split into >=2 lane-aligned tiles so both v7x
        # TensorCores get a balanced share (costs only ~0.35us/extra step on v5e/v6e).
        td = int(pl.cdiv(int(pl.cdiv(d, 2)), 128)) * 128
    else:
        td = d                            # single full-width block: no alignment constraint
    d_pad = int(pl.cdiv(d, td)) * td
    if d_pad != d:
        # Zero-padded rows produce zero scores and are sliced off below.
        defs = jnp.pad(defs, ((0, 0), (0, d_pad - d), (0, 0)))
    grid = (b, d_pad // td)

    score3 = pl.pallas_call(
        poly_encoder_score_kernel,
        out_shape=jax.ShapeDtypeStruct((b, 1, d_pad), jnp.float32),   # lane-dense scores
        grid_spec=pltpu.PrefetchScalarGridSpec(
            num_scalar_prefetch=0,
            grid=grid,
            in_specs=[
                pl.BlockSpec((1, 1, hidden), lambda bi, di: (bi, 0, 0)),    # item_b
                pl.BlockSpec((1, td, hidden), lambda bi, di: (bi, di, 0)),  # defs tile
            ],
            out_specs=pl.BlockSpec((1, 1, td), lambda bi, di: (bi, 0, di)),
        ),
        compiler_params=pltpu.CompilerParams(
            dimension_semantics=("parallel", "parallel")),  # shard pairs/tiles across TCs
    )(items.reshape(b, 1, hidden), defs)

    score = score3[:, 0, :d].astype(out_dtype)
    # attended_context == item broadcast over the definitions axis (exact, see header);
    # no (B, D, H) kernel writeback needed.
    ctx = jnp.broadcast_to(items[:, None, :], (b, d, hidden)).astype(out_dtype)
    return ctx, score


def poly_encoder_forward(item_embedding, definition_embeddings, code_weights,
                         mwe_code_weights=None, mwe=False, *, block_d=2048):
    """Single-pair mirror of PolyEncoderModule.forward(item_embedding, definition_embeddings, mwe)."""
    item = jnp.asarray(item_embedding).reshape(1, -1)                 # (1, H)
    defs = jnp.asarray(definition_embeddings)[None]                   # (1, D, H)
    ctx, score = poly_encoder_forward_batched(item, defs, code_weights,
                                              mwe_code_weights, mwe=mwe, block_d=block_d)
    return ctx[0], score[0]


if __name__ == "__main__":
    # Small shapes consistent with the module: hidden=32, num_codes=16.
    H, C = 32, 16
    key = jax.random.PRNGKey(0)
    k1, k2, k3, k4, k5, k6, k7 = jax.random.split(key, 7)

    # xavier_normal_ init for Embedding(num_codes, hidden): std = sqrt(2 / (C + H))
    std = (2.0 / (C + H)) ** 0.5
    code_weights = std * jax.random.normal(k1, (C, H), jnp.float32)
    mwe_code_weights = std * jax.random.normal(k2, (C, H), jnp.float32)

    def reference(item, defs, codes):
        """Pure-JAX transliteration of the PyTorch forward (both softmaxes kept)."""
        it = item.reshape(1, -1)
        w1 = jax.nn.softmax(codes @ it.T, axis=-1)            # (C, 1) -- softmax over size-1 axis
        code_att = w1 @ it                                     # (C, H)
        w2 = jax.nn.softmax(defs @ code_att.T, axis=-1)        # (D, C)
        ctx = w2 @ code_att                                    # (D, H)
        score = (ctx * defs).sum(-1)                           # (D,)
        return ctx, score

    item_embedding = jax.random.normal(k3, (H,), jnp.float32)

    # Case 1: tiny D=8 (single full-width block).
    defs_small = jax.random.normal(k4, (8, H), jnp.float32)
    ctx1, score1 = poly_encoder_forward(item_embedding, defs_small,
                                        code_weights, mwe_code_weights, mwe=False)
    jax.block_until_ready((ctx1, score1))
    ctx1_exp, score1_exp = reference(item_embedding, defs_small, code_weights)
    assert ctx1.shape == (8, H) and score1.shape == (8,)
    assert jnp.allclose(ctx1, ctx1_exp, rtol=1e-4, atol=1e-4)
    assert jnp.allclose(score1, score1_exp, rtol=1e-4, atol=1e-4)

    # Case 2: D=300, single pair -> split into two 256-wide lane-aligned tiles
    # (v7x core balance) and exercises zero-padding of the definitions axis.
    defs_big = jax.random.normal(k5, (300, H), jnp.float32)
    ctx2, score2 = poly_encoder_forward(item_embedding, defs_big,
                                        code_weights, mwe_code_weights, mwe=True)
    jax.block_until_ready((ctx2, score2))
    ctx2_exp, score2_exp = reference(item_embedding, defs_big, mwe_code_weights)
    assert ctx2.shape == (300, H) and score2.shape == (300,)
    assert jnp.allclose(ctx2, ctx2_exp, rtol=1e-4, atol=1e-4)
    assert jnp.allclose(score2, score2_exp, rtol=1e-4, atol=1e-4)

    # Case 3: batched path -- B=3 pairs, D=40, ONE pallas_call for all pairs
    # (implements the previous version's batching TODO).
    items_b = jax.random.normal(k6, (3, H), jnp.float32)
    defs_b = jax.random.normal(k7, (3, 40, H), jnp.float32)
    ctx3, score3 = poly_encoder_forward_batched(items_b, defs_b,
                                                code_weights, mwe_code_weights, mwe=False)
    jax.block_until_ready((ctx3, score3))
    assert ctx3.shape == (3, 40, H) and score3.shape == (3, 40)
    for i in range(3):
        ctx_exp, score_exp = reference(items_b[i], defs_b[i], code_weights)
        assert jnp.allclose(ctx3[i], ctx_exp, rtol=1e-4, atol=1e-4)
        assert jnp.allclose(score3[i], score_exp, rtol=1e-4, atol=1e-4)

    print("KERNEL_OK")
</pallas_src>

<mosaic_0001>
module attributes {stable_mosaic.version = 11 : i64} {
  func.func @poly_encoder_score_kernel(%arg0: i32, %arg1: i32, %arg2: memref<1x1x32xf32, #tpu.memory_space<vmem>>, %arg3: memref<1x8x32xf32, #tpu.memory_space<vmem>>, %arg4: memref<1x1x8xf32, #tpu.memory_space<vmem>>) attributes {dimension_semantics = [#tpu.dimension_semantics<parallel>, #tpu.dimension_semantics<parallel>], iteration_bounds = array<i64: 1, 1>, scalar_prefetch = 0 : i64, scratch_operands = 0 : i64, tpu.core_type = #tpu.core_type<tc>, window_params = [{transform_indices = @transform_0, window_bounds = array<i64: 1, 1, 32>}, {transform_indices = @transform_1, window_bounds = array<i64: 1, 8, 32>}, {transform_indices = @transform_2, window_bounds = array<i64: 1, 1, 8>}]} {
    %c0 = arith.constant 0 : index
    %c0_0 = arith.constant 0 : index
    %c0_1 = arith.constant 0 : index
    %0 = vector.load %arg2[%c0, %c0_0, %c0_1] : memref<1x1x32xf32, #tpu.memory_space<vmem>>, vector<1x1x32xf32>
    %1 = vector.shape_cast %0 : vector<1x1x32xf32> to vector<1x32xf32>
    %c0_2 = arith.constant 0 : index
    %c0_3 = arith.constant 0 : index
    %c0_4 = arith.constant 0 : index
    %2 = vector.load %arg3[%c0_2, %c0_3, %c0_4] : memref<1x8x32xf32, #tpu.memory_space<vmem>>, vector<1x8x32xf32>
    %3 = vector.shape_cast %2 : vector<1x8x32xf32> to vector<8x32xf32>
    %cst = arith.constant dense<0.000000e+00> : vector<1x8xf32>
    %4 = tpu.matmul %1, %3, %cst {dimension_numbers = #tpu.dot_dimension_numbers<[1], [1], [0], [0], [0, 0, 1, 0], [], []>} : vector<1x32xf32>, vector<8x32xf32>, vector<1x8xf32> -> vector<1x8xf32>
    %c0_5 = arith.constant 0 : index
    %c0_6 = arith.constant 0 : index
    %c0_7 = arith.constant 0 : index
    %5 = vector.load %arg4[%c0_5, %c0_6, %c0_7] : memref<1x1x8xf32, #tpu.memory_space<vmem>>, vector<1x1x8xf32>
    %6 = vector.shape_cast %5 : vector<1x1x8xf32> to vector<1x8xf32>
    %7 = vector.shape_cast %4 : vector<1x8xf32> to vector<1x1x8xf32>
    tpu.vector_store %arg4[%c0_5, %c0_6, %c0_7], %7 {strides = array<i32>} : memref<1x1x8xf32, #tpu.memory_space<vmem>>, vector<1x1x8xf32>,
    return
  }
  func.func @transform_0(%arg0: i32, %arg1: i32) -> (i32, i32, i32) {
    %c0_i32 = arith.constant 0 : i32
    %c0_i32_0 = arith.constant 0 : i32
    %c0_i32_1 = arith.constant 0 : i32
    return %arg0, %c0_i32, %c0_i32_0 : i32, i32, i32
  }
  func.func @transform_1(%arg0: i32, %arg1: i32) -> (i32, i32, i32) {
    %c0_i32 = arith.constant 0 : i32
    %c0_i32_0 = arith.constant 0 : i32
    return %arg0, %arg1, %c0_i32 : i32, i32, i32
  }
  func.func @transform_2(%arg0: i32, %arg1: i32) -> (i32, i32, i32) {
    %c0_i32 = arith.constant 0 : i32
    %c0_i32_0 = arith.constant 0 : i32
    return %arg0, %c0_i32, %arg1 : i32, i32, i32
  }
}

</mosaic_0001>

<bundles_post_ra>
// kernel: tpu_custom_call.1
= control target key start
LH: loop header
LB: loop body
LE: loop exit
PB: predicated region body
PF: predicated region fallthrough
CT: control target
= control target key end

     0   :  { %7 = vsyncpa [#allocation3], 0  ;;  %s275_s0 = inlined_call_operand.hbm [shape: f32[1,1,32], index: 0, kind: input, shape index: {}]   ;;  %s276_s1 = inlined_call_operand.hbm [shape: f32[1,8,32], index: 1, kind: input, shape index: {}]   ;;  %s277_s2 = inlined_call_operand.hbm [shape: f32[1,1,8], index: 2, kind: output, shape index: {}]  }
   0x1   :  { %8 = vsyncpa [#allocation6], 0 }
   0x2   :  { %9 = vsyncpa [#allocation4], 0  ;;  %s219_s9 = smov [#allocation2]   ;;  %s220_s11 = smov [#allocation5]  }
   0x3   :  { %s16_s10 = sshll.u32 %s219_s9, 4  ;;  %s26_s12 = sshll.u32 %s220_s11, 4  ;;  %s17_s10 = int_to_ptr.vmem [resolvable:$true] %s16_s10  ;;  %s27_s12 = int_to_ptr.vmem [resolvable:$true] %s26_s12 }
   0x4   :  { %s147_s15 = scalar_lea.hbm %s275_s0, 16 }
   0x5   :  { %p148_p0 = scmp.ne.s32.totalorder %s275_s0, %s147_s15  ;;  %p151_p1 = scmp.lt.u32.totalorder %s147_s15, %s275_s0 }
   0x7   :  { %p153_p2 = pnand %p151_p1, %p148_p0 }
   0x9   :  { %156 = shalt.err (!%p153_p2)
}
   0xa   :  { %s157_s20 = scalar_lea.vmem %s17_s10, 16  ;;  %s161_s21 = scalar_lea.vmem %s17_s10, 32 }
   0xb   :  { %p158_p3 = scmp.ne.s32.totalorder %s17_s10, %s157_s20  ;;  %p162_p4 = scmp.lt.s32.totalorder %s17_s10, %s17_s10 }
   0xc   :  { %p163_p5 = scmp.lt.s32.totalorder %s161_s21, %s157_s20 }
   0xe   :  { %p164_p6 = por %p163_p5, %p162_p4 }
  0x10   :  { %p165_p7 = pnand %p164_p6, %p158_p3 }
  0x12   :  { %168 = shalt.err (!%p165_p7)
}
  0x13   :  { %19 = dma.hbm_to_vmem [thread:$0]  %s275_s0, 16, %s17_s10, [#allocation3]  }
  0x14   :  { %s169_s26 = scalar_lea.hbm %s276_s1, 128 }
  0x15   :  { %p170_p8 = scmp.ne.s32.totalorder %s276_s1, %s169_s26  ;;  %p173_p9 = scmp.lt.u32.totalorder %s169_s26, %s276_s1 }
  0x17   :  { %p175_p10 = pnand %p173_p9, %p170_p8 }
  0x19   :  { %178 = shalt.err (!%p175_p10)
}
  0x1a   :  { %s179_s3 = scalar_lea.vmem %s27_s12, 128  ;;  %p184_p12 = scmp.lt.s32.totalorder %s27_s12, %s27_s12 }
  0x1b   :  { %p180_p11 = scmp.ne.s32.totalorder %s27_s12, %s179_s3  ;;  %p185_p13 = scmp.lt.s32.totalorder %s179_s3, %s179_s3 }
  0x1d   :  { %p186_p0 = por %p185_p13, %p184_p12 }
  0x1f   :  { %p187_p1 = pnand %p186_p0, %p180_p11 }
  0x21   :  { %190 = shalt.err (!%p187_p1)
}
  0x22   :  { %29 = dma.hbm_to_vmem [thread:$0]  %s276_s1, 128, %s27_s12, [#allocation6]  }
  0x23   :  { %213 = dma.done.wait [#allocation3], 16  }
  0x24   :  { %214 = vsyncadd [#allocation3], 4294967280 }
  0x25   :  { %215 = dma.done.wait [#allocation6], 128  }
  0x26   :  { %216 = vsyncadd [#allocation6], 4294967168  ;;  %v221_v0 = vmov 0.0   ;;  %vm222_vm0 = vmmov 0   ;;  %vm38_vm1 = vcmask 261120   ;;  %v37_v1 = vld [vmem:[#allocation5] sm:$0xff] }
  0x27   :  { %137 = vmatprep.subr.mxu0 %v221_v0  ;;  %139 = vmatprep.mubr.msk.f32.mxu0 %vm222_vm0, %v221_v0  ;;  %v36_v2 = vld [vmem:[#allocation2] sm:$0x1]  ;;  %s223_s5 = smov [#allocation7]   ;;  %vm115_vm2 = vcmask 57344  }
  0x28   :  { %138 = vmatpush3.xpose.msk.msra.mxu0 %vm38_vm1, %v37_v1  ;;  %s123_s6 = sshll.u32 %s223_s5, 4  ;;  %s124_s6 = int_to_ptr.vmem [resolvable:$true] %s123_s6 }
  0x29   :  { %s191_s1 = scalar_lea.vmem %s124_s6, 16  ;;  %s195_s7 = scalar_lea.vmem %s124_s6, 32 }
  0x2a   :  { %p192_p2 = scmp.ne.s32.totalorder %s124_s6, %s191_s1  ;;  %p196_p3 = scmp.lt.s32.totalorder %s124_s6, %s124_s6 }
  0x2b   :  { %140 = vmatmul.mubr.msk.f32.vlgmr.msra.gmra.mrb[0].mxu0 %vm38_vm1, %v36_v2  ;;  %p197_p4 = scmp.lt.s32.totalorder %s195_s7, %s191_s1 }
  0x2d   :  { %p198_p5 = por %p197_p4, %p196_p3 }
  0x2f   :  { %p199_p6 = pnand %p198_p5, %p192_p2 }
  0xfe   :  { %v111_v3 = vpop.f32.mrb[0].mxu0 }
  0xff   :  { %v141_v4 = vpop.f32.mrb[1].mxu0  ;;  %116 = vst.msk [vmem:[#allocation7] sm:$0x1] %vm115_vm2, %v111_v3 }
 0x100   :  { %202 = shalt.err (!%p199_p6)
}
 0x101   :  { %s203_s10 = scalar_lea.hbm %s277_s2, 16 }
 0x102   :  { %p204_p7 = scmp.ne.s32.totalorder %s277_s2, %s203_s10  ;;  %p207_p8 = scmp.lt.u32.totalorder %s203_s10, %s277_s2 }
 0x104   :  { %p209_p9 = pnand %p207_p8, %p204_p7 }
 0x106   :  { %212 = shalt.err (!%p209_p9)
}
 0x107   :  { %126 = dma.vmem_to_hbm [thread:$0]  %s124_s6, 16, %s277_s2, [#allocation4]  }
 0x108   :  { %217 = dma.done.wait [#allocation4], 16  }
 0x109   :  { %218 = vsyncadd [#allocation4], 4294967280 }
 0x10a   :  { %130 = vsyncpa [#allocation3], 1 }
 0x10b   :  { %131 = vsyncpa [#allocation6], 1 }
 0x10c   :  { %132 = vsyncpa [#allocation4], 1 }

</bundles_post_ra>
